<compile_context>
chip_gen: v7x
topology: tpu7x:2x2x1
jax: 0.10.0
libtpu: 0.0.40
codegen_flags: <defaults>
</compile_context>

<pallas_src>
import functools
import math

import jax
import jax.numpy as jnp
from jax.experimental import pallas as pl
from jax.experimental.pallas import tpu as pltpu


_VMEM_LIMIT_BYTES = 32 * 1024 * 1024   # explicit; safe on v5e/v6e (128 MiB) and v7x (64 MiB)
_TARGET_BLOCK_BYTES = 4 * 1024 * 1024  # per-stream (x / out) block target


# ---------------------------------------------------------------------------
# Parameter (buffer) setup — deterministic, mirrors the PyTorch __init__.
# Built & pre-cast ONCE at init so the forward pass does no per-call slice/cast.
# ---------------------------------------------------------------------------
def make_positional_encoding(d_model: int, max_len: int = 200,
                             dtype=jnp.float32) -> jnp.ndarray:
    """Builds the (max_len, d_model) sinusoidal table (== pe.squeeze(1) in torch)."""
    position = jnp.arange(max_len, dtype=jnp.float32)[:, None]           # (L, 1)
    div_term = jnp.exp(
        jnp.arange(0, d_model, 2, dtype=jnp.float32)
        * (-math.log(10000.0) / d_model)
    )                                                                     # (ceil(D/2),)
    pe = jnp.zeros((max_len, d_model), dtype=jnp.float32)
    pe = pe.at[:, 0::2].set(jnp.sin(position * div_term))
    # Slice so odd d_model does not break (PyTorch original would error here).
    pe = pe.at[:, 1::2].set(jnp.cos(position * div_term)[:, : d_model // 2])
    return pe.astype(dtype)


# ---------------------------------------------------------------------------
# Kernels
# ---------------------------------------------------------------------------
def _pe_add_bcast_kernel(x_ref, pe_ref, o_ref, *, batch: int):
    """x_ref/o_ref: (ts, B*D) tiles; pe_ref: (ts, D) tile.

    Broadcasts pe over the batch axis in VMEM (lane-axis repeat) and adds.
    The tile/add work lands on XLU/VPU slots that are idle in this
    bandwidth-bound kernel, so it is hidden under the DMA stream.
    """
    pe_tile = pe_ref[...].astype(x_ref.dtype)
    if batch > 1:
        pe_tile = jnp.tile(pe_tile, (1, batch))          # (ts, D) -> (ts, B*D)
    o_ref[...] = (x_ref[...] + pe_tile).astype(o_ref.dtype)


def _add_kernel(x_ref, pe_ref, o_ref):
    """Plain elementwise add on matching (tr, W) tiles (corner-case path)."""
    o_ref[...] = (x_ref[...] + pe_ref[...]).astype(o_ref.dtype)


# ---------------------------------------------------------------------------
# Tiling heuristic
# ---------------------------------------------------------------------------
def _choose_tile_rows(n_rows: int, row_bytes: int,
                      target_bytes: int = _TARGET_BLOCK_BYTES) -> int:
    """Rows per block: ~target_bytes per x/out stream, multiple of 8, and with
    at least 2 (ideally 4) grid steps so v7x's two TensorCores both get work
    and short sequences still pipeline DMA against compute."""
    if n_rows <= 8:
        return n_rows                                   # block == full dim, always legal
    ts = min(n_rows, max(8, target_bytes // max(row_bytes, 1)))
    ts = max(8, (ts // 8) * 8)                          # sublane dim multiple of 8
    for want_steps in (4, 2):                           # prefer >=4, accept >=2
        if n_rows >= 8 * want_steps:
            ts = min(ts, max(8, ((n_rows // want_steps) // 8) * 8))
            break
    return ts


# ---------------------------------------------------------------------------
# Wrapper: out[s, b, :] = x[s, b, :] + pe_table[s, :]   (broadcast over batch)
# ---------------------------------------------------------------------------
def positional_encoding_forward(x: jnp.ndarray, pe_table: jnp.ndarray,
                                *, donate_x: bool = False) -> jnp.ndarray:
    """x: (S, B, D); pe_table: (max_len, D) pre-built table (same "dtype" class as x)."""
    S, B, D = x.shape
    max_len, d_model = pe_table.shape
    assert d_model == D and max_len >= S

    BD = B * D
    itemsize = jnp.dtype(x.dtype).itemsize
    compiler_params = pltpu.CompilerParams(
        dimension_semantics=("parallel",),              # v7x: shard seq tiles over 2 TCs
        vmem_limit_bytes=_VMEM_LIMIT_BYTES,
    )
    # Donating x avoids a full-size output allocation, but only if the caller
    # actually gives up x; otherwise XLA inserts a copy, so default is off.
    io_alias = {0: 0} if donate_x else {}

    lane_dense = (BD % 128 == 0)
    can_repack = (S * BD) % 128 == 0

    if lane_dense or not can_repack:
        # --- Primary path: rows == sequence positions --------------------
        # x viewed as (S, B*D); pe streamed as its natural (ts, D) tile and
        # broadcast over batch inside the kernel (no full-size pe HBM stream).
        x2 = x.reshape(S, BD)
        ts = _choose_tile_rows(S, BD * itemsize)
        grid = (pl.cdiv(S, ts),)
        out2 = pl.pallas_call(
            functools.partial(_pe_add_bcast_kernel, batch=B),
            out_shape=jax.ShapeDtypeStruct((S, BD), x.dtype),
            grid=grid,
            in_specs=[
                pl.BlockSpec((ts, BD), lambda s: (s, 0)),   # x tile (full payload)
                pl.BlockSpec((ts, D), lambda s: (s, 0)),    # tiny pe tile (1/B payload)
            ],
            out_specs=pl.BlockSpec((ts, BD), lambda s: (s, 0)),
            input_output_aliases=io_alias,
            compiler_params=compiler_params,
        )(x2, pe_table)
        return out2.reshape(S, B, D)

    # --- Corner case (B*D not 128-aligned, but S*B*D is) ------------------
    # Repack to a lane-dense (rows, W) view with W a multiple of 128 so stores
    # are unmasked vst (matters most on v5e's single store slot).  Rows cross
    # sequence positions here, so pe must be pre-broadcast — acceptable only in
    # this small/unaligned corner case (e.g. the demo's D=32, B=2).
    total = S * BD
    W = 128
    while total % (W * 2) == 0 and W * 2 <= 8192:
        W *= 2
    rows = total // W
    x2 = x.reshape(rows, W)
    pe2 = jnp.broadcast_to(
        pe_table[:S, None, :].astype(x.dtype), (S, B, D)).reshape(rows, W)
    tr = _choose_tile_rows(rows, W * itemsize)
    grid = (pl.cdiv(rows, tr),)
    out2 = pl.pallas_call(
        _add_kernel,
        out_shape=jax.ShapeDtypeStruct((rows, W), x.dtype),
        grid=grid,
        in_specs=[
            pl.BlockSpec((tr, W), lambda r: (r, 0)),
            pl.BlockSpec((tr, W), lambda r: (r, 0)),
        ],
        out_specs=pl.BlockSpec((tr, W), lambda r: (r, 0)),
        input_output_aliases=io_alias,
        compiler_params=compiler_params,
    )(x2, pe2)
    return out2.reshape(S, B, D)


# ---------------------------------------------------------------------------
# Demo / self-test
# ---------------------------------------------------------------------------
if __name__ == "__main__":
    key = jax.random.PRNGKey(0)

    # Shape implied by the module defaults: (seq=8, batch=2, d_model=32).
    # B*D = 64 is not 128-aligned -> exercises the lane-dense repack path.
    SEQ, BATCH, D_MODEL, MAX_LEN = 8, 2, 32, 200
    x = jax.random.normal(key, (SEQ, BATCH, D_MODEL), dtype=jnp.float32)
    pe = make_positional_encoding(D_MODEL, MAX_LEN, dtype=jnp.float32)

    out = jax.block_until_ready(positional_encoding_forward(x, pe))
    ref = x + pe[:SEQ, None, :]
    assert out.shape == x.shape and out.dtype == x.dtype
    assert jnp.allclose(out, ref, atol=1e-6, rtol=1e-6)

    # Second small shape with B*D % 128 == 0 -> exercises the primary
    # (in-kernel pe broadcast, multi-tile parallel grid) path.
    S2, B2, D2 = 16, 2, 128
    x_big = jax.random.normal(jax.random.fold_in(key, 1), (S2, B2, D2),
                              dtype=jnp.float32)
    pe_big = make_positional_encoding(D2, MAX_LEN, dtype=jnp.float32)
    out_big = jax.block_until_ready(positional_encoding_forward(x_big, pe_big))
    ref_big = x_big + pe_big[:S2, None, :]
    assert jnp.allclose(out_big, ref_big, atol=1e-6, rtol=1e-6)

    print("KERNEL_OK")
</pallas_src>

<mosaic_0001>
module attributes {stable_mosaic.version = 11 : i64} {
  func.func @_add_kernel(%arg0: i32, %arg1: memref<1x512xf32, #tpu.memory_space<vmem>>, %arg2: memref<1x512xf32, #tpu.memory_space<vmem>>, %arg3: memref<1x512xf32, #tpu.memory_space<vmem>>) attributes {dimension_semantics = [#tpu.dimension_semantics<parallel>], iteration_bounds = array<i64: 1>, scalar_prefetch = 0 : i64, scratch_operands = 0 : i64, tpu.core_type = #tpu.core_type<tc>, window_params = [{transform_indices = @transform_0, window_bounds = array<i64: 1, 512>}, {transform_indices = @transform_1, window_bounds = array<i64: 1, 512>}, {transform_indices = @transform_2, window_bounds = array<i64: 1, 512>}]} {
    %c0 = arith.constant 0 : index
    %c0_0 = arith.constant 0 : index
    %0 = vector.load %arg1[%c0, %c0_0] : memref<1x512xf32, #tpu.memory_space<vmem>>, vector<1x512xf32>
    %c0_1 = arith.constant 0 : index
    %c0_2 = arith.constant 0 : index
    %1 = vector.load %arg2[%c0_1, %c0_2] : memref<1x512xf32, #tpu.memory_space<vmem>>, vector<1x512xf32>
    %2 = arith.addf %0, %1 : vector<1x512xf32>
    %c0_3 = arith.constant 0 : index
    %c0_4 = arith.constant 0 : index
    %3 = vector.load %arg3[%c0_3, %c0_4] : memref<1x512xf32, #tpu.memory_space<vmem>>, vector<1x512xf32>
    tpu.vector_store %arg3[%c0_3, %c0_4], %2 {strides = array<i32>} : memref<1x512xf32, #tpu.memory_space<vmem>>, vector<1x512xf32>,
    return
  }
  func.func @transform_0(%arg0: i32) -> (i32, i32) {
    %c0_i32 = arith.constant 0 : i32
    %c0_i32_0 = arith.constant 0 : i32
    return %arg0, %c0_i32 : i32, i32
  }
  func.func @transform_1(%arg0: i32) -> (i32, i32) {
    %c0_i32 = arith.constant 0 : i32
    %c0_i32_0 = arith.constant 0 : i32
    return %arg0, %c0_i32 : i32, i32
  }
  func.func @transform_2(%arg0: i32) -> (i32, i32) {
    %c0_i32 = arith.constant 0 : i32
    %c0_i32_0 = arith.constant 0 : i32
    return %arg0, %c0_i32 : i32, i32
  }
}

</mosaic_0001>

<bundles_post_ra>
// kernel: tpu_custom_call.1
= control target key start
LH: loop header
LB: loop body
LE: loop exit
PB: predicated region body
PF: predicated region fallthrough
CT: control target
= control target key end

     0   :  { %7 = vsyncpa [#allocation3], 0  ;;  %s189_s0 = inlined_call_operand.hbm [shape: f32[1,512], index: 0, kind: input, shape index: {}]   ;;  %s190_s1 = inlined_call_operand.hbm [shape: f32[1,512], index: 1, kind: input, shape index: {}]   ;;  %s191_s2 = inlined_call_operand.hbm [shape: f32[1,512], index: 2, kind: output, shape index: {}]  }
   0x1   :  { %8 = vsyncpa [#allocation6], 0 }
   0x2   :  { %9 = vsyncpa [#allocation4], 0  ;;  %s135_s9 = smov [#allocation2]   ;;  %s136_s11 = smov [#allocation5]  }
   0x3   :  { %s16_s10 = sshll.u32 %s135_s9, 4  ;;  %s26_s12 = sshll.u32 %s136_s11, 4  ;;  %s17_s10 = int_to_ptr.vmem [resolvable:$true] %s16_s10  ;;  %s27_s12 = int_to_ptr.vmem [resolvable:$true] %s26_s12 }
   0x4   :  { %s63_s15 = scalar_lea.hbm %s189_s0, 64 }
   0x5   :  { %p64_p0 = scmp.ne.s32.totalorder %s189_s0, %s63_s15  ;;  %p67_p1 = scmp.lt.u32.totalorder %s63_s15, %s189_s0 }
   0x7   :  { %p69_p2 = pnand %p67_p1, %p64_p0 }
   0x9   :  { %72 = shalt.err (!%p69_p2)
}
   0xa   :  { %s73_s20 = scalar_lea.vmem %s17_s10, 64  ;;  %p78_p4 = scmp.lt.s32.totalorder %s17_s10, %s17_s10 }
   0xb   :  { %p74_p3 = scmp.ne.s32.totalorder %s17_s10, %s73_s20  ;;  %p79_p5 = scmp.lt.s32.totalorder %s73_s20, %s73_s20 }
   0xd   :  { %p80_p6 = por %p79_p5, %p78_p4 }
   0xf   :  { %p81_p7 = pnand %p80_p6, %p74_p3 }
  0x11   :  { %84 = shalt.err (!%p81_p7)
}
  0x12   :  { %19 = dma.hbm_to_vmem [thread:$0]  %s189_s0, 64, %s17_s10, [#allocation3]  }
  0x13   :  { %s85_s25 = scalar_lea.hbm %s190_s1, 64 }
  0x14   :  { %p86_p8 = scmp.ne.s32.totalorder %s190_s1, %s85_s25  ;;  %p89_p9 = scmp.lt.u32.totalorder %s85_s25, %s190_s1 }
  0x16   :  { %p91_p10 = pnand %p89_p9, %p86_p8 }
  0x18   :  { %94 = shalt.err (!%p91_p10)
}
  0x19   :  { %s95_s30 = scalar_lea.vmem %s27_s12, 64  ;;  %p100_p12 = scmp.lt.s32.totalorder %s27_s12, %s27_s12 }
  0x1a   :  { %p96_p11 = scmp.ne.s32.totalorder %s27_s12, %s95_s30  ;;  %p101_p13 = scmp.lt.s32.totalorder %s95_s30, %s95_s30 }
  0x1c   :  { %p102_p0 = por %p101_p13, %p100_p12 }
  0x1e   :  { %p103_p1 = pnand %p102_p0, %p96_p11 }
  0x20   :  { %106 = shalt.err (!%p103_p1)
}
  0x21   :  { %29 = dma.hbm_to_vmem [thread:$0]  %s190_s1, 64, %s27_s12, [#allocation6]  }
  0x22   :  { %129 = dma.done.wait [#allocation3], 64  }
  0x23   :  { %130 = vsyncadd [#allocation3], 4294967232 }
  0x24   :  { %131 = dma.done.wait [#allocation6], 64  }
  0x25   :  { %132 = vsyncadd [#allocation6], 4294967232  ;;  %v39_v0 = vlaneseq  ;;  %s137_s4 = smov [#allocation7]   ;;  %v36_v1 = vld [vmem:[#allocation2] sm:$0xf] }
  0x26   :  { %s50_s5 = sshll.u32 %s137_s4, 4  ;;  %v37_v2 = vld [vmem:[#allocation5] sm:$0xf]  ;;  %s51_s5 = int_to_ptr.vmem [resolvable:$true] %s50_s5 }
  0x27   :  { %vm41_vm0 = vcmp.lt.s32.totalorder %v39_v0, 512  ;;  %v38_v3 = vadd.f32 %v37_v2, %v36_v1  ;;  %s107_s6 = scalar_lea.vmem %s51_s5, 64  ;;  %p112_p3 = scmp.lt.s32.totalorder %s51_s5, %s51_s5 }
  0x28   :  { %p108_p2 = scmp.ne.s32.totalorder %s51_s5, %s107_s6  ;;  %p113_p4 = scmp.lt.s32.totalorder %s107_s6, %s107_s6 }
  0x29   :  { %43 = vst.msk [vmem:[#allocation7] sm:$0xf] %vm41_vm0, %v38_v3 }
  0x2a   :  { %p114_p5 = por %p113_p4, %p112_p3 }
  0x2c   :  { %p115_p6 = pnand %p114_p5, %p108_p2 }
  0x2e   :  { %118 = shalt.err (!%p115_p6)
}
  0x2f   :  { %s119_s8 = scalar_lea.hbm %s191_s2, 64 }
  0x30   :  { %p120_p7 = scmp.ne.s32.totalorder %s191_s2, %s119_s8  ;;  %p123_p8 = scmp.lt.u32.totalorder %s119_s8, %s191_s2 }
  0x32   :  { %p125_p9 = pnand %p123_p8, %p120_p7 }
  0x34   :  { %128 = shalt.err (!%p125_p9)
}
  0x35   :  { %53 = dma.vmem_to_hbm [thread:$0]  %s51_s5, 64, %s191_s2, [#allocation4]  }
  0x36   :  { %133 = dma.done.wait [#allocation4], 64  }
  0x37   :  { %134 = vsyncadd [#allocation4], 4294967232 }
  0x38   :  { %57 = vsyncpa [#allocation3], 1 }
  0x39   :  { %58 = vsyncpa [#allocation6], 1 }
  0x3a   :  { %59 = vsyncpa [#allocation4], 1 }

</bundles_post_ra>
